<compile_context>
chip_gen: v6e
topology: v6e:2x2x1
jax: 0.10.0
libtpu: 0.0.40
codegen_flags: <defaults>
</compile_context>

<pallas_src>
import numpy as np
import jax
import jax.numpy as jnp
from jax import lax
from jax.experimental import pallas as pl
from jax.experimental.pallas import tpu as pltpu


# -----------------------------------------------------------------------------
# Fused Pallas kernel
# -----------------------------------------------------------------------------
def make_fused_cnn_kernel(B, Cin, L, block_cfg, block_rows, lin_row, n_classes):
    """block_cfg: list of (Cout, K).  block_rows / lin_row: row offsets into the
    packed parameter buffer (weights in cols [0:K*Cin], bias in col K*Cin)."""

    def kernel(x_ref, p_ref, out_ref):
        # ---- Carve all parameters out of the single packed VMEM buffer. ----
        ws, bs = [], []
        cin = Cin
        for (cout, K), r0 in zip(block_cfg, block_rows):
            kc = K * cin
            ws.append(p_ref[r0:r0 + cout, 0:kc])          # (Cout, K*Cin)
            bs.append(p_ref[r0:r0 + cout, kc:kc + 1])     # (Cout, 1)
            cin = cout
        c_last = block_cfg[-1][0]
        lw = p_ref[lin_row:lin_row + n_classes, 0:c_last]            # (ncls, C_last)
        lb = p_ref[lin_row:lin_row + n_classes, c_last:c_last + 1]   # (ncls, 1)

        feat_cols = []
        for b in range(B):                      # tiny batch -> unrolled
            cur = x_ref[b]                      # (Cin, L): channels x lanes (NCL slice)
            d = 1                               # lane dilation of valid samples
            Lv = L                              # number of valid samples
            for (cout, K), w, bias in zip(block_cfg, ws, bs):
                Lc = Lv - K + 1                 # conv output length (VALID, stride 1)
                Wc = (Lc - 1) * d + 1           # lanes spanned by the dilated output
                # Conv1d as ONE matmul: stack K dilated tap shifts on the
                # contraction (sublane) axis.
                x_stk = jnp.concatenate(
                    [cur[:, k * d:k * d + Wc] for k in range(K)], axis=0)
                y = jnp.dot(w, x_stk, preferred_element_type=jnp.float32) + bias
                y = jnp.maximum(y, 0.0)         # ReLU
                # MaxPool1d(2): max with a d-lane shift; result stays dilated (x2),
                # valid samples now every 2*d lanes.  Floor semantics (Lc // 2) match
                # PyTorch because the last unpaired conv sample is never selected.
                cur = jnp.maximum(y[:, :Wc - d], y[:, d:Wc])
                Lv = Lc // 2
                d = 2 * d
                # TODO(synk): Dropout (p=0.0 / eval mode) is identity -> omitted.

            # AdaptiveAvgPool1d(1): mean over the Lv valid (dilated) lane positions.
            col = lax.broadcasted_iota(jnp.int32, cur.shape, 1)
            valid = jnp.logical_and((col & (d - 1)) == 0, col < Lv * d)
            feat = jnp.sum(jnp.where(valid, cur, 0.0), axis=1, keepdims=True)
            feat_cols.append(feat * (1.0 / Lv))            # (C_last, 1)

        feat = jnp.concatenate(feat_cols, axis=1)          # (C_last, B)
        out = jnp.dot(lw, feat, preferred_element_type=jnp.float32) + lb  # (ncls, B)
        out_ref[...] = out.T                               # (B, ncls)

    return kernel


# -----------------------------------------------------------------------------
# Host-side parameter packing (one contiguous f32 buffer -> one DMA)
# -----------------------------------------------------------------------------
def pack_params(params):
    """Pack all conv/linear weights+biases into one f32 buffer.
    Each section occupies Cout rows: weight matrix (Cout, K*Cin) in columns
    [0, K*Cin) with tap-major columns (col = k*Cin + c), bias in column K*Cin."""
    sections, block_cfg = [], []
    for (w, b) in params["blocks"]:
        cout, cin, K = w.shape
        w_mat = np.transpose(np.asarray(w, np.float32), (0, 2, 1)).reshape(cout, K * cin)
        sections.append((w_mat, np.asarray(b, np.float32)))
        block_cfg.append((cout, K))
    lw = np.asarray(params["lin_w"], np.float32)           # (ncls, C_last)
    lb = np.asarray(params["lin_b"], np.float32)
    sections.append((lw, lb))

    rows = sum(s[0].shape[0] for s in sections)
    cols = max(s[0].shape[1] + 1 for s in sections)
    buf = np.zeros((rows, cols), np.float32)
    offsets, r = [], 0
    for w_mat, bias in sections:
        nr, nc = w_mat.shape
        buf[r:r + nr, 0:nc] = w_mat
        buf[r:r + nr, nc] = bias
        offsets.append(r)
        r += nr
    n_classes = lw.shape[0]
    return jnp.asarray(buf), block_cfg, offsets[:-1], offsets[-1], n_classes


def cnn_model_forward(x_ncl, packed, block_cfg, block_rows, lin_row, n_classes):
    """x_ncl: (B, n_features, L) -- same NCL layout as the PyTorch module."""
    B, Cin, L = x_ncl.shape
    kernel = make_fused_cnn_kernel(B, Cin, L, block_cfg, block_rows, lin_row, n_classes)
    return pl.pallas_call(
        kernel,
        out_shape=jax.ShapeDtypeStruct((B, n_classes), jnp.float32),
        in_specs=[pl.BlockSpec(memory_space=pltpu.MemorySpace.VMEM),
                  pl.BlockSpec(memory_space=pltpu.MemorySpace.VMEM)],
        out_specs=pl.BlockSpec(memory_space=pltpu.MemorySpace.VMEM),
    )(x_ncl, packed)


# -----------------------------------------------------------------------------
# Pure-JAX reference (correctness check)
# -----------------------------------------------------------------------------
def reference_forward(x_ncl, params):
    x = x_ncl
    for (w, b) in params["blocks"]:
        y = lax.conv_general_dilated(
            x, w, window_strides=(1,), padding="VALID",
            dimension_numbers=("NCH", "OIH", "NCH"),
            precision=lax.Precision.HIGHEST)
        y = jnp.maximum(y + b[None, :, None], 0.0)
        Bb, C, Lout = y.shape
        P = Lout // 2
        x = jnp.max(y[:, :, :2 * P].reshape(Bb, C, P, 2), axis=-1)
    feat = jnp.mean(x, axis=-1)                  # AdaptiveAvgPool1d(1) + Flatten
    return jnp.dot(feat, params["lin_w"].T,
                   precision=lax.Precision.HIGHEST) + params["lin_b"]


# -----------------------------------------------------------------------------
# Main
# -----------------------------------------------------------------------------
if __name__ == "__main__":
    # Hyperparameters of the synthetic CnnModel instance.
    n_features = 4
    length_sequence = 64
    n_classes = 5
    filter_arrays = [8, 16]     # hparams['cell_array']
    kernel_size = 3             # hparams['kernel_size']
    batch = 2                   # act_fn = ReLU, dropout = 0.0 (inference)

    # Deterministic parameters + input, all derived from PRNGKey(0).
    key = jax.random.PRNGKey(0)
    key, kx = jax.random.split(key)
    params = {"blocks": []}
    in_ch = n_features
    for filters in filter_arrays:
        key, kw, kb = jax.random.split(key, 3)
        w = 0.1 * jax.random.normal(kw, (filters, in_ch, kernel_size), jnp.float32)
        b = 0.1 * jax.random.normal(kb, (filters,), jnp.float32)
        params["blocks"].append((w, b))
        in_ch = filters
    key, kw, kb = jax.random.split(key, 3)
    params["lin_w"] = 0.1 * jax.random.normal(kw, (n_classes, filter_arrays[-1]), jnp.float32)
    params["lin_b"] = 0.1 * jax.random.normal(kb, (n_classes,), jnp.float32)

    x = jax.random.normal(kx, (batch, n_features, length_sequence), jnp.float32)

    packed, block_cfg, block_rows, lin_row, ncls = pack_params(params)

    out = jax.block_until_ready(
        cnn_model_forward(x, packed, block_cfg, block_rows, lin_row, ncls))
    ref = jax.block_until_ready(reference_forward(x, params))

    assert out.shape == (batch, n_classes), out.shape
    assert jnp.allclose(out, ref, atol=1e-3, rtol=1e-3), (out, ref)
    print("KERNEL_OK")
</pallas_src>

<mosaic_0001>
module attributes {stable_mosaic.version = 11 : i64} {
  func.func @kernel(%arg0: memref<2x4x64xf32, #tpu.memory_space<vmem>>, %arg1: memref<29x25xf32, #tpu.memory_space<vmem>>, %arg2: memref<2x5xf32, #tpu.memory_space<vmem>>) attributes {dimension_semantics = [], scalar_prefetch = 0 : i64, scratch_operands = 0 : i64, tpu.core_type = #tpu.core_type<tc>} {
    %c0 = arith.constant 0 : index
    %c0_0 = arith.constant 0 : index
    %0 = vector.load %arg1[%c0, %c0_0] : memref<29x25xf32, #tpu.memory_space<vmem>>, vector<8x12xf32>
    %c0_1 = arith.constant 0 : index
    %c12 = arith.constant 12 : index
    %1 = vector.load %arg1[%c0_1, %c12] : memref<29x25xf32, #tpu.memory_space<vmem>>, vector<8x1xf32>
    %c8 = arith.constant 8 : index
    %c0_2 = arith.constant 0 : index
    %2 = vector.load %arg1[%c8, %c0_2] : memref<29x25xf32, #tpu.memory_space<vmem>>, vector<16x24xf32>
    %c8_3 = arith.constant 8 : index
    %c24 = arith.constant 24 : index
    %3 = vector.load %arg1[%c8_3, %c24] : memref<29x25xf32, #tpu.memory_space<vmem>>, vector<16x1xf32>
    %c24_4 = arith.constant 24 : index
    %c0_5 = arith.constant 0 : index
    %4 = vector.load %arg1[%c24_4, %c0_5] : memref<29x25xf32, #tpu.memory_space<vmem>>, vector<5x16xf32>
    %c24_6 = arith.constant 24 : index
    %c16 = arith.constant 16 : index
    %5 = vector.load %arg1[%c24_6, %c16] : memref<29x25xf32, #tpu.memory_space<vmem>>, vector<5x1xf32>
    %c0_7 = arith.constant 0 : index
    %c0_8 = arith.constant 0 : index
    %c0_9 = arith.constant 0 : index
    %6 = vector.load %arg0[%c0_7, %c0_8, %c0_9] : memref<2x4x64xf32, #tpu.memory_space<vmem>>, vector<1x4x64xf32>
    %7 = vector.shape_cast %6 : vector<1x4x64xf32> to vector<4x64xf32>
    %8 = vector.extract_strided_slice %7 {offsets = [0, 0], sizes = [4, 62], strides = [1, 1]} : vector<4x64xf32> to vector<4x62xf32>
    %9 = vector.extract_strided_slice %7 {offsets = [0, 1], sizes = [4, 62], strides = [1, 1]} : vector<4x64xf32> to vector<4x62xf32>
    %10 = vector.extract_strided_slice %7 {offsets = [0, 2], sizes = [4, 62], strides = [1, 1]} : vector<4x64xf32> to vector<4x62xf32>
    %11 = tpu.concatenate %8, %9, %10 in 0 : vector<4x62xf32>, vector<4x62xf32>, vector<4x62xf32> -> vector<12x62xf32>
    %cst = arith.constant dense<0.000000e+00> : vector<8x62xf32>
    %12 = tpu.matmul %0, %11, %cst {dimension_numbers = #tpu.dot_dimension_numbers<[1], [0], [0], [1], [0, 0, 1, 1], [], []>} : vector<8x12xf32>, vector<12x62xf32>, vector<8x62xf32> -> vector<8x62xf32>
    %13 = vector.broadcast %1 : vector<8x1xf32> to vector<8x62xf32>
    %14 = arith.addf %12, %13 : vector<8x62xf32>
    %cst_10 = arith.constant 0.000000e+00 : f32
    %15 = vector.broadcast %cst_10 : f32 to vector<8x62xf32>
    %16 = arith.maximumf %14, %15 : vector<8x62xf32>
    %17 = vector.extract_strided_slice %16 {offsets = [0, 0], sizes = [8, 61], strides = [1, 1]} : vector<8x62xf32> to vector<8x61xf32>
    %18 = vector.extract_strided_slice %16 {offsets = [0, 1], sizes = [8, 61], strides = [1, 1]} : vector<8x62xf32> to vector<8x61xf32>
    %19 = arith.maximumf %17, %18 : vector<8x61xf32>
    %20 = vector.extract_strided_slice %19 {offsets = [0, 0], sizes = [8, 57], strides = [1, 1]} : vector<8x61xf32> to vector<8x57xf32>
    %21 = vector.extract_strided_slice %19 {offsets = [0, 2], sizes = [8, 57], strides = [1, 1]} : vector<8x61xf32> to vector<8x57xf32>
    %22 = vector.extract_strided_slice %19 {offsets = [0, 4], sizes = [8, 57], strides = [1, 1]} : vector<8x61xf32> to vector<8x57xf32>
    %23 = tpu.concatenate %20, %21, %22 in 0 : vector<8x57xf32>, vector<8x57xf32>, vector<8x57xf32> -> vector<24x57xf32>
    %cst_11 = arith.constant dense<0.000000e+00> : vector<16x57xf32>
    %24 = tpu.matmul %2, %23, %cst_11 {dimension_numbers = #tpu.dot_dimension_numbers<[1], [0], [0], [1], [0, 0, 1, 1], [], []>} : vector<16x24xf32>, vector<24x57xf32>, vector<16x57xf32> -> vector<16x57xf32>
    %25 = vector.broadcast %3 : vector<16x1xf32> to vector<16x57xf32>
    %26 = arith.addf %24, %25 : vector<16x57xf32>
    %cst_12 = arith.constant 0.000000e+00 : f32
    %27 = vector.broadcast %cst_12 : f32 to vector<16x57xf32>
    %28 = arith.maximumf %26, %27 : vector<16x57xf32>
    %29 = vector.extract_strided_slice %28 {offsets = [0, 0], sizes = [16, 55], strides = [1, 1]} : vector<16x57xf32> to vector<16x55xf32>
    %30 = vector.extract_strided_slice %28 {offsets = [0, 2], sizes = [16, 55], strides = [1, 1]} : vector<16x57xf32> to vector<16x55xf32>
    %31 = arith.maximumf %29, %30 : vector<16x55xf32>
    %32 = tpu.iota {dimensions = array<i32: 1>} : vector<16x55xi32>
    %c3_i32 = arith.constant 3 : i32
    %33 = vector.broadcast %c3_i32 : i32 to vector<16x55xi32>
    %34 = arith.andi %32, %33 : vector<16x55xi32>
    %c0_i32 = arith.constant 0 : i32
    %35 = vector.broadcast %c0_i32 : i32 to vector<16x55xi32>
    %36 = arith.cmpi eq, %34, %35 : vector<16x55xi32>
    %c56_i32 = arith.constant 56 : i32
    %37 = vector.broadcast %c56_i32 : i32 to vector<16x55xi32>
    %38 = arith.cmpi slt, %32, %37 : vector<16x55xi32>
    %39 = arith.andi %36, %38 : vector<16x55xi1>
    %cst_13 = arith.constant 0.000000e+00 : f32
    %40 = vector.broadcast %cst_13 : f32 to vector<16x55xf32>
    %41 = arith.select %39, %31, %40 : vector<16x55xi1>, vector<16x55xf32>
    %cst_14 = arith.constant dense<0.000000e+00> : vector<16xf32>
    %42 = vector.multi_reduction <add>, %41, %cst_14 [1] : vector<16x55xf32> to vector<16xf32>
    %43 = vector.shape_cast %42 : vector<16xf32> to vector<16x1xf32>
    %cst_15 = arith.constant 0.0714285746 : f32
    %44 = vector.broadcast %cst_15 : f32 to vector<16x1xf32>
    %45 = arith.mulf %43, %44 : vector<16x1xf32>
    %c1 = arith.constant 1 : index
    %c0_16 = arith.constant 0 : index
    %c0_17 = arith.constant 0 : index
    %46 = vector.load %arg0[%c1, %c0_16, %c0_17] : memref<2x4x64xf32, #tpu.memory_space<vmem>>, vector<1x4x64xf32>
    %47 = vector.shape_cast %46 : vector<1x4x64xf32> to vector<4x64xf32>
    %48 = vector.extract_strided_slice %47 {offsets = [0, 0], sizes = [4, 62], strides = [1, 1]} : vector<4x64xf32> to vector<4x62xf32>
    %49 = vector.extract_strided_slice %47 {offsets = [0, 1], sizes = [4, 62], strides = [1, 1]} : vector<4x64xf32> to vector<4x62xf32>
    %50 = vector.extract_strided_slice %47 {offsets = [0, 2], sizes = [4, 62], strides = [1, 1]} : vector<4x64xf32> to vector<4x62xf32>
    %51 = tpu.concatenate %48, %49, %50 in 0 : vector<4x62xf32>, vector<4x62xf32>, vector<4x62xf32> -> vector<12x62xf32>
    %cst_18 = arith.constant dense<0.000000e+00> : vector<8x62xf32>
    %52 = tpu.matmul %0, %51, %cst_18 {dimension_numbers = #tpu.dot_dimension_numbers<[1], [0], [0], [1], [0, 0, 1, 1], [], []>} : vector<8x12xf32>, vector<12x62xf32>, vector<8x62xf32> -> vector<8x62xf32>
    %53 = vector.broadcast %1 : vector<8x1xf32> to vector<8x62xf32>
    %54 = arith.addf %52, %53 : vector<8x62xf32>
    %cst_19 = arith.constant 0.000000e+00 : f32
    %55 = vector.broadcast %cst_19 : f32 to vector<8x62xf32>
    %56 = arith.maximumf %54, %55 : vector<8x62xf32>
    %57 = vector.extract_strided_slice %56 {offsets = [0, 0], sizes = [8, 61], strides = [1, 1]} : vector<8x62xf32> to vector<8x61xf32>
    %58 = vector.extract_strided_slice %56 {offsets = [0, 1], sizes = [8, 61], strides = [1, 1]} : vector<8x62xf32> to vector<8x61xf32>
    %59 = arith.maximumf %57, %58 : vector<8x61xf32>
    %60 = vector.extract_strided_slice %59 {offsets = [0, 0], sizes = [8, 57], strides = [1, 1]} : vector<8x61xf32> to vector<8x57xf32>
    %61 = vector.extract_strided_slice %59 {offsets = [0, 2], sizes = [8, 57], strides = [1, 1]} : vector<8x61xf32> to vector<8x57xf32>
    %62 = vector.extract_strided_slice %59 {offsets = [0, 4], sizes = [8, 57], strides = [1, 1]} : vector<8x61xf32> to vector<8x57xf32>
    %63 = tpu.concatenate %60, %61, %62 in 0 : vector<8x57xf32>, vector<8x57xf32>, vector<8x57xf32> -> vector<24x57xf32>
    %cst_20 = arith.constant dense<0.000000e+00> : vector<16x57xf32>
    %64 = tpu.matmul %2, %63, %cst_20 {dimension_numbers = #tpu.dot_dimension_numbers<[1], [0], [0], [1], [0, 0, 1, 1], [], []>} : vector<16x24xf32>, vector<24x57xf32>, vector<16x57xf32> -> vector<16x57xf32>
    %65 = vector.broadcast %3 : vector<16x1xf32> to vector<16x57xf32>
    %66 = arith.addf %64, %65 : vector<16x57xf32>
    %cst_21 = arith.constant 0.000000e+00 : f32
    %67 = vector.broadcast %cst_21 : f32 to vector<16x57xf32>
    %68 = arith.maximumf %66, %67 : vector<16x57xf32>
    %69 = vector.extract_strided_slice %68 {offsets = [0, 0], sizes = [16, 55], strides = [1, 1]} : vector<16x57xf32> to vector<16x55xf32>
    %70 = vector.extract_strided_slice %68 {offsets = [0, 2], sizes = [16, 55], strides = [1, 1]} : vector<16x57xf32> to vector<16x55xf32>
    %71 = arith.maximumf %69, %70 : vector<16x55xf32>
    %72 = tpu.iota {dimensions = array<i32: 1>} : vector<16x55xi32>
    %c3_i32_22 = arith.constant 3 : i32
    %73 = vector.broadcast %c3_i32_22 : i32 to vector<16x55xi32>
    %74 = arith.andi %72, %73 : vector<16x55xi32>
    %c0_i32_23 = arith.constant 0 : i32
    %75 = vector.broadcast %c0_i32_23 : i32 to vector<16x55xi32>
    %76 = arith.cmpi eq, %74, %75 : vector<16x55xi32>
    %c56_i32_24 = arith.constant 56 : i32
    %77 = vector.broadcast %c56_i32_24 : i32 to vector<16x55xi32>
    %78 = arith.cmpi slt, %72, %77 : vector<16x55xi32>
    %79 = arith.andi %76, %78 : vector<16x55xi1>
    %cst_25 = arith.constant 0.000000e+00 : f32
    %80 = vector.broadcast %cst_25 : f32 to vector<16x55xf32>
    %81 = arith.select %79, %71, %80 : vector<16x55xi1>, vector<16x55xf32>
    %cst_26 = arith.constant dense<0.000000e+00> : vector<16xf32>
    %82 = vector.multi_reduction <add>, %81, %cst_26 [1] : vector<16x55xf32> to vector<16xf32>
    %83 = vector.shape_cast %82 : vector<16xf32> to vector<16x1xf32>
    %cst_27 = arith.constant 0.0714285746 : f32
    %84 = vector.broadcast %cst_27 : f32 to vector<16x1xf32>
    %85 = arith.mulf %83, %84 : vector<16x1xf32>
    %86 = tpu.concatenate %45, %85 in 1 : vector<16x1xf32>, vector<16x1xf32> -> vector<16x2xf32>
    %cst_28 = arith.constant dense<0.000000e+00> : vector<5x2xf32>
    %87 = tpu.matmul %4, %86, %cst_28 {dimension_numbers = #tpu.dot_dimension_numbers<[1], [0], [0], [1], [0, 0, 1, 1], [], []>} : vector<5x16xf32>, vector<16x2xf32>, vector<5x2xf32> -> vector<5x2xf32>
    %88 = vector.broadcast %5 : vector<5x1xf32> to vector<5x2xf32>
    %89 = arith.addf %87, %88 : vector<5x2xf32>
    %90 = tpu.transpose %89, [1, 0] : vector<5x2xf32> -> vector<2x5xf32>
    %c0_29 = arith.constant 0 : index
    %c0_30 = arith.constant 0 : index
    %91 = vector.load %arg2[%c0_29, %c0_30] : memref<2x5xf32, #tpu.memory_space<vmem>>, vector<2x5xf32>
    tpu.vector_store %arg2[%c0_29, %c0_30], %90 {strides = array<i32>} : memref<2x5xf32, #tpu.memory_space<vmem>>, vector<2x5xf32>,
    return
  }
}

</mosaic_0001>

<bundles_post_ra>
// kernel: tpu_custom_call.1
= control target key start
LH: loop header
LB: loop body
LE: loop exit
PB: predicated region body
PF: predicated region fallthrough
CT: control target
= control target key end

     0   :  { %7 = vsyncpa [#allocation3], 0  ;;  %s824_s0 = inlined_call_operand.hbm [shape: f32[2,4,64], index: 0, kind: input, shape index: {}]   ;;  %s825_s1 = inlined_call_operand.hbm [shape: f32[29,25], index: 1, kind: input, shape index: {}]   ;;  %s826_s2 = inlined_call_operand.hbm [shape: f32[2,5], index: 2, kind: output, shape index: {}]  }
   0x1   :  { %8 = vsyncpa [#allocation6], 0 }
   0x2   :  { %9 = vsyncpa [#allocation4], 0  ;;  %s741_s9 = smov [#allocation2]  }
   0x3   :  { %s15_s10 = sshll.u32 %s741_s9, 4  ;;  %s16_s10 = int_to_ptr.vmem [resolvable:$true] %s15_s10 }
   0x4   :  { %s683_s11 = scalar_lea.vmem %s16_s10, 128  ;;  %p688_p1 = scmp.lt.s32.totalorder %s16_s10, %s16_s10 }
   0x5   :  { %p684_p0 = scmp.ne.s32.totalorder %s16_s10, %s683_s11  ;;  %p689_p2 = scmp.lt.s32.totalorder %s683_s11, %s683_s11 }
   0x7   :  { %p690_p3 = por %p689_p2, %p688_p1 }
   0x9   :  { %p691_p4 = pnand %p690_p3, %p684_p0 }
   0xb   :  { %694 = shalt.err (!%p691_p4)
}
   0xc   :  { %s742_s12 = smov 64   ;;  %s743_s13 = smov 4  }
   0xd   :  { %21 = dma.hbm_to_vmem [thread:$0]  %s824_s0, 128, %s16_s10, [#allocation3], %s742_s12, %s742_s12, %s743_s13  }
   0xe   :  { %s744_s16 = smov [#allocation5]  }
   0xf   :  { %s27_s17 = sshll.u32 %s744_s16, 4  ;;  %s28_s17 = int_to_ptr.vmem [resolvable:$true] %s27_s17 }
  0x10   :  { %s703_s18 = scalar_lea.vmem %s28_s17, 512  ;;  %p708_p6 = scmp.lt.s32.totalorder %s28_s17, %s28_s17 }
  0x11   :  { %p704_p5 = scmp.ne.s32.totalorder %s28_s17, %s703_s18  ;;  %p709_p7 = scmp.lt.s32.totalorder %s703_s18, %s703_s18 }
  0x13   :  { %p710_p8 = por %p709_p7, %p708_p6 }
  0x15   :  { %p711_p9 = pnand %p710_p8, %p704_p5 }
  0x17   :  { %714 = shalt.err (!%p711_p9)
}
  0x18   :  { %s745_s19 = smov 128   ;;  %s746_s20 = smov 8  }
  0x19   :  { %33 = dma.hbm_to_vmem [thread:$0]  %s825_s1, 512, %s28_s17, [#allocation6], %s745_s19, %s745_s19, %s746_s20  }
  0x1a   :  { %735 = dma.done.wait [#allocation3], 128  }
  0x1b   :  { %736 = vsyncadd [#allocation3], 4294967168 }
  0x1c   :  { %737 = dma.done.wait [#allocation6], 512  }
  0x1d   :  { %738 = vsyncadd [#allocation6], 4294966784  ;;  %v747_v0 = vmov 0.0   ;;  %vm748_vm0 = vmmov 0   ;;  %v749_v1 = vmov 12   ;;  %s750_s0 = smov 126   ;;  %v249_v47 = vlaneseq }
  0x1e   :  { %617 = vmatprep.subr.mxu0 %v747_v0  ;;  %621 = vmatprep.mubr.msk.f32.mxu0 %vm748_vm0, %v747_v0  ;;  %v44_v2 = vld [vmem:[#allocation2] sm:$0xf]  ;;  %v267_v3 = vld [vmem:[#allocation2 + $0x4] sm:$0xf]  ;;  %s751_s1 = smov 127   ;;  %v40_v6 = vld [vmem:[#allocation5] sm:$0xff] }
  0x1f   :  { %671 = vset.pattern.permute.xlu0 %v749_v1  ;;  %273 = vrot.lane.b32.xlu1 %v267_v3, %s750_s0  ;;  %v46_v4 = vrot.slane %v44_v2, 4  ;;  %v269_v5 = vrot.slane %v267_v3, 4  ;;  %vm52_vm1 = vcmask 1043456   ;;  %vm59_vm2 = vcmask 97280   ;;  %v41_v22 = vld [vmem:[#allocation5 + $0x8] sm:$0xff]  ;;  %s752_s23 = smov 124  }
  0x20   :  { %50 = vrot.lane.b32.xlu0 %v44_v2, %s750_s0  ;;  %vm157_vm3 = vcmask 195584   ;;  %v753_v26 = vmov 24   ;;  %v42_v28 = vld [vmem:[#allocation5 + $0x10] sm:$0xff]  ;;  %v250_v48 = vand.u32 127, %v249_v47  ;;  %vm257_vm7 = vcmask 449536   ;;  %s755_s24 = smov [#allocation7]  }
  0x21   :  { %630 = vmatprep.mubr.msk.f32.mxu1 %vm157_vm3, %v41_v22  ;;  %673 = vset.pattern.permute.xlu1 %v753_v26  ;;  %vm458_vm8 = vcmask 7168   ;;  %vm466_vm9 = vcmask 130048   ;;  %s579_s25 = sshll.u32 %s755_s24, 4  ;;  %vm571_vm10 = vcmask 33792   ;;  %s580_s25 = int_to_ptr.vmem [resolvable:$true] %s579_s25 }
  0x22   :  { %v251_v49 = vand.u32 3, %v250_v48  ;;  %vm253_vm5 = vcmp.lt.s32.totalorder %v250_v48, 56  ;;  %s715_s26 = scalar_lea.vmem %s580_s25, 32  ;;  %p720_p11 = scmp.lt.s32.totalorder %s580_s25, %s580_s25 }
  0x23   :  { %270 = vrot.lane.b32.xlu1 %v269_v5, %s751_s1  ;;  %v43_v5 = vld [vmem:[#allocation5 + $0x18] sm:$0x1f]  ;;  %p716_p10 = scmp.ne.s32.totalorder %s580_s25, %s715_s26  ;;  %p721_p12 = scmp.lt.s32.totalorder %s715_s26, %s715_s26 }
  0x24   :  { %47 = vrot.lane.b32.xlu0 %v46_v4, %s751_s1  ;;  %vm252_vm4 = vcmp.eq.s32.totalorder %v251_v49, 0  ;;  %v754_v4 = vmov 16  }
  0x25   :  { %vm804_vm6 = vmand %vm252_vm4, %vm253_vm5  ;;  %p722_p13 = por %p721_p12, %p720_p11 }
  0x27   :  { %p723_p0 = pnand %p722_p13, %p716_p10 }
  0x28   :  { %56 = vperm.xlu0 %671, %v40_v6  }
  0x2c   :  { %672 = vset.pattern.permute.xlu0 %v753_v26 }
  0x91   :  { %v274_v8 = vpop.permute.xlu1 %273 }
  0x92   :  { %v51_v7 = vpop.permute.xlu0 %50 }
  0x93   :  { %618 = vmatpush3.msk.msra.mxu0 %vm52_vm1, %v51_v7 }
  0x94   :  { %619 = vmatprep.subr.mxu0 %v747_v0 }
  0x95   :  { %v271_v10 = vpop.permute.xlu1 %270 }
  0x96   :  { %v48_v9 = vpop.permute.xlu0 %47  ;;  %v275_v12 = vsel %vm52_vm1, %v267_v3, %v271_v10 }
  0x97   :  { %v53_v11 = vsel %vm52_vm1, %v44_v2, %v48_v9 }
  0x98   :  { %620 = vmatpush3.msra.mxu0 %v53_v11 }
  0x99   :  { %622 = vmatmul.mubr.msk.f32.vlgmr.msra.gmra.mxu0 %vm59_vm2, %v40_v6  ;;  %633 = vmatprep.subr.mxu0 %v747_v0 }
  0x9a   :  { %634 = vmatpush3.msk.msra.mxu0 %vm52_vm1, %v274_v8  ;;  %637 = vmatprep.mubr.msk.f32.mxu0 %vm748_vm0, %v747_v0 }
  0x9b   :  { %635 = vmatprep.subr.mxu0 %v747_v0 }
  0x9c   :  { %636 = vmatpush3.msra.mxu0 %v275_v12 }
  0x9d   :  { %638 = vmatmul.mubr.msk.f32.vlgmr.msra.gmra.mxu0 %vm59_vm2, %v40_v6  ;;  %649 = vmatprep.subr.mxu0 %v747_v0 }
  0x9e   :  { %653 = vmatprep.mubr.msk.f32.mxu0 %vm748_vm0, %v747_v0 }
  0xa3   :  { %v57_v13 = vpop.permute.xlu0 %56 }
 0x159   :  { %v130_v14 = vpop.f32.mrf.mxu0 }
 0x15a   :  { %v131_v15 = vadd.f32 %v130_v14, %v57_v13 }
 0x15b   :  { %v623_v16 = vpop.f32.mrf.mxu0 }
 0x15c   :  { %v134_v17 = vmax.f32 %v131_v15, 0.0 }
 0x15d   :  { %v344_v18 = vpop.f32.mrf.mxu0 }
 0x15e   :  { %v345_v19 = vadd.f32 %v344_v18, %v57_v13  ;;  %136 = vrot.lane.b32.xlu1 %v134_v17, %s751_s1 }
 0x15f   :  { %v639_v20 = vpop.f32.mrf.mxu0 }
 0x160   :  { %v348_v21 = vmax.f32 %v345_v19, 0.0 }
 0x162   :  { %350 = vrot.lane.b32.xlu1 %v348_v21, %s751_s1 }
 0x1d0   :  { %v137_v23 = vpop.permute.xlu1 %136 }
 0x1d1   :  { %v139_v24 = vmax.f32 %v134_v17, %v137_v23 }
 0x1d3   :  { %144 = vrot.lane.b32.xlu0 %v139_v24, %s752_s23  ;;  %141 = vrot.lane.b32.xlu1 %v139_v24, %s750_s0 }
 0x1d4   :  { %v351_v25 = vpop.permute.xlu1 %350 }
 0x1d5   :  { %v353_v27 = vmax.f32 %v348_v21, %v351_v25 }
 0x1d7   :  { %355 = vrot.lane.b32.xlu1 %v353_v27, %s750_s0  ;;  %358 = vrot.lane.b32.xlu0 %v353_v27, %s752_s23 }
 0x1db   :  { %154 = vperm.xlu0 %672, %v42_v28   ;;  %149 = vperm.xlu1 %673, %v41_v22  }
 0x1df   :  { %674 = vset.pattern.permute.xlu0 %v754_v4 }
 0x245   :  { %v145_v29 = vpop.permute.xlu0 %144  ;;  %v142_v30 = vpop.permute.xlu1 %141 }
 0x246   :  { %624 = vmatprep.subr.mxu1 %v145_v29 }
 0x247   :  { %625 = vmatpush3.msra.mxu1 %v145_v29 }
 0x248   :  { %626 = vmatprep.subr.mxu1 %v142_v30 }
 0x249   :  { %627 = vmatpush3.msra.mxu1 %v142_v30  ;;  %v359_v31 = vpop.permute.xlu0 %358  ;;  %v356_v32 = vpop.permute.xlu1 %355 }
 0x24a   :  { %628 = vmatprep.subr.mxu1 %v139_v24 }
 0x24b   :  { %629 = vmatpush3.msra.mxu1 %v139_v24 }
 0x24c   :  { %631 = vmatmul.mubr.msk.f32.vlgmr.msra.gmra.mxu1 %vm157_vm3, %v42_v28  ;;  %640 = vmatprep.subr.mxu1 %v359_v31 }
 0x24d   :  { %641 = vmatpush3.msra.mxu1 %v359_v31  ;;  %646 = vmatprep.mubr.msk.f32.mxu1 %vm157_vm3, %v41_v22 }
 0x24e   :  { %642 = vmatprep.subr.mxu1 %v356_v32 }
 0x24f   :  { %643 = vmatpush3.msra.mxu1 %v356_v32 }
 0x250   :  { %644 = vmatprep.subr.mxu1 %v353_v27 }
 0x251   :  { %645 = vmatpush3.msra.mxu1 %v353_v27 }
 0x252   :  { %647 = vmatmul.mubr.msk.f32.vlgmr.msra.gmra.mxu1 %vm157_vm3, %v42_v28 }
 0x256   :  { %v155_v33 = vpop.permute.xlu0 %154  ;;  %v150_v35 = vpop.permute.xlu1 %149 }
 0x30c   :  { %v632_v34 = vpop.f32.mrf.mxu1 }
 0x30d   :  { %v234_v36 = vadd.f32 %v632_v34, %v155_v33 }
 0x30e   :  { %v228_v37 = vpop.f32.mrf.mxu1 }
 0x30f   :  { %v238_v38 = vmax.f32 %v234_v36, 0.0  ;;  %v229_v39 = vadd.f32 %v228_v37, %v150_v35 }
 0x311   :  { %243 = vrot.lane.b32.xlu1 %v238_v38, %s750_s0  ;;  %v237_v41 = vmax.f32 %v229_v39, 0.0 }
 0x312   :  { %v648_v40 = vpop.f32.mrf.mxu1 }
 0x313   :  { %v433_v42 = vadd.f32 %v648_v40, %v155_v33 }
 0x314   :  { %v427_v43 = vpop.f32.mrf.mxu1 }
 0x315   :  { %v437_v44 = vmax.f32 %v433_v42, 0.0  ;;  %v428_v45 = vadd.f32 %v427_v43, %v150_v35  ;;  %241 = vrot.lane.b32.xlu1 %v237_v41, %s750_s0 }
 0x317   :  { %442 = vrot.lane.b32.xlu0 %v437_v44, %s750_s0  ;;  %v436_v46 = vmax.f32 %v428_v45, 0.0 }
 0x31b   :  { %440 = vrot.lane.b32.xlu0 %v436_v46, %s750_s0 }
 0x383   :  { %v244_v50 = vpop.permute.xlu1 %243 }
 0x384   :  { %v248_v52 = vmax.f32 %v238_v38, %v244_v50 }
 0x386   :  { %v256_v53 = vsel %vm804_vm6, %v248_v52, 0.0 }
 0x387   :  { %v242_v54 = vpop.permute.xlu1 %241  ;;  %v261_v55 = vsel %vm257_vm7, %v256_v53, 0.0 }
 0x388   :  { %262 = vadd.xlane.f32.xlu1 %v261_v55  ;;  %v247_v57 = vmax.f32 %v237_v41, %v242_v54 }
 0x389   :  { %v443_v56 = vpop.permute.xlu0 %442 }
 0x38a   :  { %v447_v58 = vmax.f32 %v437_v44, %v443_v56  ;;  %v255_v63 = vsel %vm804_vm6, %v247_v57, 0.0 }
 0x38b   :  { %v258_v3 = vsel %vm257_vm7, %v255_v63, 0.0 }
 0x38c   :  { %v449_v59 = vsel %vm804_vm6, %v447_v58, 0.0 }
 0x38d   :  { %v441_v60 = vpop.permute.xlu0 %440  ;;  %v453_v61 = vsel %vm257_vm7, %v449_v59, 0.0 }
 0x38e   :  { %v446_v62 = vmax.f32 %v436_v46, %v441_v60  ;;  %454 = vadd.xlane.f32.xlu0 %v453_v61 }
 0x390   :  { %v448_v1 = vsel %vm804_vm6, %v446_v62, 0.0 }
 0x391   :  { %v450_v2 = vsel %vm257_vm7, %v448_v1, 0.0 }
 0x392   :  { %451 = vadd.xlane.f32.xlu1 %v450_v2  ;;  %259 = vadd.xlane.f32.xlu0 %v258_v3 }
 0x3a8   :  { %463 = vperm.xlu0 %674, %v43_v5  }
 0x411   :  { %v263_v6 = vpop.xlane.xlu1 %262 }
 0x412   :  { %v265_v8 = vmul.f32 0.071428575, %v263_v6 }
 0x417   :  { %v455_v7 = vpop.xlane.xlu0 %454 }
 0x418   :  { %v457_v9 = vmul.f32 0.071428575, %v455_v7 }
 0x41a   :  { %v460_v10 = vsel %vm458_vm8, %v265_v8, %v457_v9 }
 0x41b   :  { %v260_v11 = vpop.xlane.xlu0 %259  ;;  %650 = vmatpush3.msra.mxu0 %v460_v10  ;;  %v452_v12 = vpop.xlane.xlu1 %451 }
 0x41c   :  { %v264_v13 = vmul.f32 0.071428575, %v260_v11  ;;  %v456_v14 = vmul.f32 0.071428575, %v452_v12  ;;  %651 = vmatprep.subr.mxu0 %v747_v0 }
 0x41e   :  { %v459_v15 = vsel %vm458_vm8, %v264_v13, %v456_v14 }
 0x41f   :  { %652 = vmatpush3.msra.mxu0 %v459_v15 }
 0x420   :  { %654 = vmatmul.mubr.msk.f32.vlgmr.msra.gmra.mxu0 %vm466_vm9, %v43_v5 }
 0x423   :  { %v464_v16 = vpop.permute.xlu0 %463 }
 0x4e0   :  { %v535_v17 = vpop.f32.mrf.mxu0 }
 0x4e1   :  { %v536_v18 = vadd.f32 %v535_v17, %v464_v16 }
 0x4e2   :  { %v655_v19 = vpop.f32.mrf.mxu0 }
 0x4e3   :  { %539 = vxpose.xlu1.b32.start.end [1/1] (short) (narrow) %v536_v18, 8 }
 0x55f   :  { %v555_v20 = vpop.trf.xlu1 }
 0x560   :  { %572 = vst.msk [vmem:[#allocation7] sm:$0x3] %vm571_vm10, %v555_v20 }
 0x561   :  { %726 = shalt.err (!%p723_p0)
}
 0x562   :  { %582 = dma.vmem_to_hbm [thread:$0]  %s580_s25, 32, %s826_s2, [#allocation4]  }
 0x563   :  { %739 = dma.done.wait [#allocation4], 32  }
 0x564   :  { %740 = vsyncadd [#allocation4], 4294967264 }
 0x565   :  { %586 = vsyncpa [#allocation3], 1 }
 0x566   :  { %587 = vsyncpa [#allocation6], 1 }
 0x567   :  { %588 = vsyncpa [#allocation4], 1 }

</bundles_post_ra>
